<compile_context>
chip_gen: v7x
topology: tpu7x:2x2x1
jax: 0.10.0
libtpu: 0.0.40
codegen_flags: <defaults>
</compile_context>

<pallas_src>
import jax
import jax.numpy as jnp
from jax.experimental import pallas as pl
from jax.experimental.pallas import tpu as pltpu

# Logical layer widths of the PyTorch Net and their 128-lane-padded versions.
LOGICAL_DIMS = (200, 100, 50, 5)
PADDED_DIMS = (256, 128, 128, 128)


def _round_up(n, m):
    return ((n + m - 1) // m) * m


def mlp_kernel(x_ref, w1_ref, b1_ref, w2_ref, b2_ref, w3_ref, b3_ref,
               w4_ref, b4_ref, o_ref):
    # fc1 + relu : cast x -> bf16 in-kernel (free on VPU), f32 MXU accumulation.
    x = x_ref[...].astype(jnp.bfloat16)
    h = jnp.dot(x, w1_ref[...], preferred_element_type=jnp.float32)
    h = jnp.maximum(h + b1_ref[...], 0.0)
    # fc2 + relu
    h = jnp.dot(h.astype(jnp.bfloat16), w2_ref[...],
                preferred_element_type=jnp.float32)
    h = jnp.maximum(h + b2_ref[...], 0.0)
    # fc3 + relu
    h = jnp.dot(h.astype(jnp.bfloat16), w3_ref[...],
                preferred_element_type=jnp.float32)
    h = jnp.maximum(h + b3_ref[...], 0.0)
    # fc4 (no activation); lane-padded (128-wide) bf16 output -> unmasked,
    # half-width stores.
    h = jnp.dot(h.astype(jnp.bfloat16), w4_ref[...],
                preferred_element_type=jnp.float32)
    o_ref[...] = (h + b4_ref[...]).astype(o_ref.dtype)


def net_forward(x, kparams, *, tile_b=1024, return_padded=False):
    """x: [B, embedding_dim] float32. kparams: padded bf16 weights / f32 biases
    (see pad_params_for_kernel).

    Returns [B, 5] bf16 (or the padded [B, 128] bf16 block if
    return_padded=True, letting the consumer fuse the lane slice)."""
    B, K = x.shape
    out_pad = kparams["w4"].shape[1]

    # Batch tile: aim for 1024 rows/step; for smaller B split the batch in
    # (at least) two so both v7x TensorCores get work; 16-row alignment for
    # bf16 sublane packing.
    tb = min(tile_b, _round_up(pl.cdiv(B, 2), 16))
    b_pad = max(_round_up(B, tb), 2 * tb)   # guarantee >= 2 grid steps
    if b_pad != B:
        x = jnp.pad(x, ((0, b_pad - B), (0, 0)))

    grid = (b_pad // tb,)

    def resident(arr):
        # Same block index every step -> fetched once, VMEM-resident.
        return pl.BlockSpec(arr.shape, lambda i: (0, 0))

    in_specs = [pl.BlockSpec((tb, K), lambda i: (i, 0))]
    for l in range(1, 5):
        in_specs.append(resident(kparams[f"w{l}"]))
        in_specs.append(resident(kparams[f"b{l}"]))

    out = pl.pallas_call(
        mlp_kernel,
        out_shape=jax.ShapeDtypeStruct((b_pad, out_pad), jnp.bfloat16),
        grid=grid,
        in_specs=in_specs,
        out_specs=pl.BlockSpec((tb, out_pad), lambda i: (i, 0)),
        compiler_params=pltpu.CompilerParams(
            dimension_semantics=("parallel",)),
    )(x,
      kparams["w1"], kparams["b1"],
      kparams["w2"], kparams["b2"],
      kparams["w3"], kparams["b3"],
      kparams["w4"], kparams["b4"])

    if return_padded:
        return out[:B]          # caller slices/fuses the lane dim lazily
    # Strip batch padding and lane padding (logical output width = 5).
    return out[:B, :LOGICAL_DIMS[-1]]


def init_params(key, embedding_dim):
    """Logical fp32 params, PyTorch nn.Linear-style fan_in init.
    Weights stored pre-transposed as [in, out]."""
    dims = [embedding_dim] + list(LOGICAL_DIMS)
    params = {}
    keys = jax.random.split(key, 8)
    for i in range(4):
        fan_in = dims[i]
        bound = 1.0 / float(fan_in) ** 0.5
        w = jax.random.uniform(keys[2 * i], (dims[i], dims[i + 1]),
                               jnp.float32, -bound, bound)
        b = jax.random.uniform(keys[2 * i + 1], (1, dims[i + 1]),
                               jnp.float32, -bound, bound)
        params[f"w{i + 1}"] = w
        params[f"b{i + 1}"] = b
    return params


def pad_params_for_kernel(params, embedding_dim):
    """Zero-pad feature dims to 128-lane multiples; weights -> bf16, biases f32.
    The contraction dim of layer 1 (embedding_dim) is intentionally NOT padded."""
    padded_in = [embedding_dim] + list(PADDED_DIMS[:-1])
    logical_in = [embedding_dim] + list(LOGICAL_DIMS[:-1])
    kparams = {}
    for i in range(4):
        w = params[f"w{i + 1}"]
        b = params[f"b{i + 1}"]
        w = jnp.pad(w, ((0, padded_in[i] - logical_in[i]),
                        (0, PADDED_DIMS[i] - LOGICAL_DIMS[i])))
        b = jnp.pad(b, ((0, 0), (0, PADDED_DIMS[i] - LOGICAL_DIMS[i])))
        kparams[f"w{i + 1}"] = w.astype(jnp.bfloat16)
        kparams[f"b{i + 1}"] = b.astype(jnp.float32)
    return kparams


def reference_forward(x, params):
    h = jnp.maximum(x @ params["w1"] + params["b1"], 0.0)
    h = jnp.maximum(h @ params["w2"] + params["b2"], 0.0)
    h = jnp.maximum(h @ params["w3"] + params["b3"], 0.0)
    return h @ params["w4"] + params["b4"]


if __name__ == "__main__":
    embedding_dim = 32
    batch = 8
    key = jax.random.PRNGKey(0)
    k_x, k_p = jax.random.split(key)
    x = jax.random.normal(k_x, (batch, embedding_dim), jnp.float32)

    params = init_params(k_p, embedding_dim)
    kparams = pad_params_for_kernel(params, embedding_dim)

    out = net_forward(x, kparams)
    out = jax.block_until_ready(out)

    ref = reference_forward(x, params)
    assert out.shape == (batch, 5)
    # bf16 weights/activations/output vs fp32 reference -> loosened tolerance.
    assert jnp.allclose(out.astype(jnp.float32), ref, atol=5e-2, rtol=5e-2), (
        float(jnp.max(jnp.abs(out.astype(jnp.float32) - ref))))
    print("KERNEL_OK")
</pallas_src>

<mosaic_0001>
module attributes {stable_mosaic.version = 11 : i64} {
  func.func @mlp_kernel(%arg0: i32, %arg1: memref<16x32xf32, #tpu.memory_space<vmem>>, %arg2: memref<32x256xbf16, #tpu.memory_space<vmem>>, %arg3: memref<1x256xf32, #tpu.memory_space<vmem>>, %arg4: memref<256x128xbf16, #tpu.memory_space<vmem>>, %arg5: memref<1x128xf32, #tpu.memory_space<vmem>>, %arg6: memref<128x128xbf16, #tpu.memory_space<vmem>>, %arg7: memref<1x128xf32, #tpu.memory_space<vmem>>, %arg8: memref<128x128xbf16, #tpu.memory_space<vmem>>, %arg9: memref<1x128xf32, #tpu.memory_space<vmem>>, %arg10: memref<16x128xbf16, #tpu.memory_space<vmem>>) attributes {dimension_semantics = [#tpu.dimension_semantics<parallel>], iteration_bounds = array<i64: 2>, scalar_prefetch = 0 : i64, scratch_operands = 0 : i64, tpu.core_type = #tpu.core_type<tc>, window_params = [{transform_indices = @transform_0, window_bounds = array<i64: 16, 32>}, {pipeline_mode = #tpu.pipeline_mode<synchronous>, transform_indices = @transform_1, window_bounds = array<i64: 32, 256>}, {pipeline_mode = #tpu.pipeline_mode<synchronous>, transform_indices = @transform_2, window_bounds = array<i64: 1, 256>}, {pipeline_mode = #tpu.pipeline_mode<synchronous>, transform_indices = @transform_3, window_bounds = array<i64: 256, 128>}, {pipeline_mode = #tpu.pipeline_mode<synchronous>, transform_indices = @transform_4, window_bounds = array<i64: 1, 128>}, {pipeline_mode = #tpu.pipeline_mode<synchronous>, transform_indices = @transform_5, window_bounds = array<i64: 128, 128>}, {pipeline_mode = #tpu.pipeline_mode<synchronous>, transform_indices = @transform_6, window_bounds = array<i64: 1, 128>}, {pipeline_mode = #tpu.pipeline_mode<synchronous>, transform_indices = @transform_7, window_bounds = array<i64: 128, 128>}, {pipeline_mode = #tpu.pipeline_mode<synchronous>, transform_indices = @transform_8, window_bounds = array<i64: 1, 128>}, {transform_indices = @transform_9, window_bounds = array<i64: 16, 128>}]} {
    %c0 = arith.constant 0 : index
    %c0_0 = arith.constant 0 : index
    %0 = vector.load %arg1[%c0, %c0_0] : memref<16x32xf32, #tpu.memory_space<vmem>>, vector<16x32xf32>
    %1 = arith.truncf %0 : vector<16x32xf32> to vector<16x32xbf16>
    %c0_1 = arith.constant 0 : index
    %c0_2 = arith.constant 0 : index
    %2 = vector.load %arg2[%c0_1, %c0_2] : memref<32x256xbf16, #tpu.memory_space<vmem>>, vector<32x256xbf16>
    %cst = arith.constant dense<0.000000e+00> : vector<16x256xf32>
    %3 = tpu.matmul %1, %2, %cst {dimension_numbers = #tpu.dot_dimension_numbers<[1], [0], [0], [1], [0, 0, 1, 1], [], []>} : vector<16x32xbf16>, vector<32x256xbf16>, vector<16x256xf32> -> vector<16x256xf32>
    %c0_3 = arith.constant 0 : index
    %c0_4 = arith.constant 0 : index
    %4 = vector.load %arg3[%c0_3, %c0_4] : memref<1x256xf32, #tpu.memory_space<vmem>>, vector<1x256xf32>
    %5 = vector.broadcast %4 : vector<1x256xf32> to vector<16x256xf32>
    %6 = arith.addf %3, %5 : vector<16x256xf32>
    %cst_5 = arith.constant 0.000000e+00 : f32
    %7 = vector.broadcast %cst_5 : f32 to vector<16x256xf32>
    %8 = arith.maximumf %6, %7 : vector<16x256xf32>
    %9 = arith.truncf %8 : vector<16x256xf32> to vector<16x256xbf16>
    %c0_6 = arith.constant 0 : index
    %c0_7 = arith.constant 0 : index
    %10 = vector.load %arg4[%c0_6, %c0_7] : memref<256x128xbf16, #tpu.memory_space<vmem>>, vector<256x128xbf16>
    %cst_8 = arith.constant dense<0.000000e+00> : vector<16x128xf32>
    %11 = tpu.matmul %9, %10, %cst_8 {dimension_numbers = #tpu.dot_dimension_numbers<[1], [0], [0], [1], [0, 0, 1, 1], [], []>} : vector<16x256xbf16>, vector<256x128xbf16>, vector<16x128xf32> -> vector<16x128xf32>
    %c0_9 = arith.constant 0 : index
    %c0_10 = arith.constant 0 : index
    %12 = vector.load %arg5[%c0_9, %c0_10] : memref<1x128xf32, #tpu.memory_space<vmem>>, vector<1x128xf32>
    %13 = vector.broadcast %12 : vector<1x128xf32> to vector<16x128xf32>
    %14 = arith.addf %11, %13 : vector<16x128xf32>
    %cst_11 = arith.constant 0.000000e+00 : f32
    %15 = vector.broadcast %cst_11 : f32 to vector<16x128xf32>
    %16 = arith.maximumf %14, %15 : vector<16x128xf32>
    %17 = arith.truncf %16 : vector<16x128xf32> to vector<16x128xbf16>
    %c0_12 = arith.constant 0 : index
    %c0_13 = arith.constant 0 : index
    %18 = vector.load %arg6[%c0_12, %c0_13] : memref<128x128xbf16, #tpu.memory_space<vmem>>, vector<128x128xbf16>
    %cst_14 = arith.constant dense<0.000000e+00> : vector<16x128xf32>
    %19 = tpu.matmul %17, %18, %cst_14 {dimension_numbers = #tpu.dot_dimension_numbers<[1], [0], [0], [1], [0, 0, 1, 1], [], []>} : vector<16x128xbf16>, vector<128x128xbf16>, vector<16x128xf32> -> vector<16x128xf32>
    %c0_15 = arith.constant 0 : index
    %c0_16 = arith.constant 0 : index
    %20 = vector.load %arg7[%c0_15, %c0_16] : memref<1x128xf32, #tpu.memory_space<vmem>>, vector<1x128xf32>
    %21 = vector.broadcast %20 : vector<1x128xf32> to vector<16x128xf32>
    %22 = arith.addf %19, %21 : vector<16x128xf32>
    %cst_17 = arith.constant 0.000000e+00 : f32
    %23 = vector.broadcast %cst_17 : f32 to vector<16x128xf32>
    %24 = arith.maximumf %22, %23 : vector<16x128xf32>
    %25 = arith.truncf %24 : vector<16x128xf32> to vector<16x128xbf16>
    %c0_18 = arith.constant 0 : index
    %c0_19 = arith.constant 0 : index
    %26 = vector.load %arg8[%c0_18, %c0_19] : memref<128x128xbf16, #tpu.memory_space<vmem>>, vector<128x128xbf16>
    %cst_20 = arith.constant dense<0.000000e+00> : vector<16x128xf32>
    %27 = tpu.matmul %25, %26, %cst_20 {dimension_numbers = #tpu.dot_dimension_numbers<[1], [0], [0], [1], [0, 0, 1, 1], [], []>} : vector<16x128xbf16>, vector<128x128xbf16>, vector<16x128xf32> -> vector<16x128xf32>
    %c0_21 = arith.constant 0 : index
    %c0_22 = arith.constant 0 : index
    %28 = vector.load %arg9[%c0_21, %c0_22] : memref<1x128xf32, #tpu.memory_space<vmem>>, vector<1x128xf32>
    %29 = vector.broadcast %28 : vector<1x128xf32> to vector<16x128xf32>
    %30 = arith.addf %27, %29 : vector<16x128xf32>
    %31 = arith.truncf %30 : vector<16x128xf32> to vector<16x128xbf16>
    %c0_23 = arith.constant 0 : index
    %c0_24 = arith.constant 0 : index
    %32 = vector.load %arg10[%c0_23, %c0_24] : memref<16x128xbf16, #tpu.memory_space<vmem>>, vector<16x128xbf16>
    tpu.vector_store %arg10[%c0_23, %c0_24], %31 {strides = array<i32>} : memref<16x128xbf16, #tpu.memory_space<vmem>>, vector<16x128xbf16>,
    return
  }
  func.func @transform_0(%arg0: i32) -> (i32, i32) {
    %c0_i32 = arith.constant 0 : i32
    %c0_i32_0 = arith.constant 0 : i32
    return %arg0, %c0_i32 : i32, i32
  }
  func.func @transform_1(%arg0: i32) -> (i32, i32) {
    %c0_i32 = arith.constant 0 : i32
    %c0_i32_0 = arith.constant 0 : i32
    %c0_i32_1 = arith.constant 0 : i32
    return %c0_i32, %c0_i32_0 : i32, i32
  }
  func.func @transform_2(%arg0: i32) -> (i32, i32) {
    %c0_i32 = arith.constant 0 : i32
    %c0_i32_0 = arith.constant 0 : i32
    %c0_i32_1 = arith.constant 0 : i32
    return %c0_i32, %c0_i32_0 : i32, i32
  }
  func.func @transform_3(%arg0: i32) -> (i32, i32) {
    %c0_i32 = arith.constant 0 : i32
    %c0_i32_0 = arith.constant 0 : i32
    %c0_i32_1 = arith.constant 0 : i32
    return %c0_i32, %c0_i32_0 : i32, i32
  }
  func.func @transform_4(%arg0: i32) -> (i32, i32) {
    %c0_i32 = arith.constant 0 : i32
    %c0_i32_0 = arith.constant 0 : i32
    %c0_i32_1 = arith.constant 0 : i32
    return %c0_i32, %c0_i32_0 : i32, i32
  }
  func.func @transform_5(%arg0: i32) -> (i32, i32) {
    %c0_i32 = arith.constant 0 : i32
    %c0_i32_0 = arith.constant 0 : i32
    %c0_i32_1 = arith.constant 0 : i32
    return %c0_i32, %c0_i32_0 : i32, i32
  }
  func.func @transform_6(%arg0: i32) -> (i32, i32) {
    %c0_i32 = arith.constant 0 : i32
    %c0_i32_0 = arith.constant 0 : i32
    %c0_i32_1 = arith.constant 0 : i32
    return %c0_i32, %c0_i32_0 : i32, i32
  }
  func.func @transform_7(%arg0: i32) -> (i32, i32) {
    %c0_i32 = arith.constant 0 : i32
    %c0_i32_0 = arith.constant 0 : i32
    %c0_i32_1 = arith.constant 0 : i32
    return %c0_i32, %c0_i32_0 : i32, i32
  }
  func.func @transform_8(%arg0: i32) -> (i32, i32) {
    %c0_i32 = arith.constant 0 : i32
    %c0_i32_0 = arith.constant 0 : i32
    %c0_i32_1 = arith.constant 0 : i32
    return %c0_i32, %c0_i32_0 : i32, i32
  }
  func.func @transform_9(%arg0: i32) -> (i32, i32) {
    %c0_i32 = arith.constant 0 : i32
    %c0_i32_0 = arith.constant 0 : i32
    return %arg0, %c0_i32 : i32, i32
  }
}

</mosaic_0001>

<bundles_post_ra>
// kernel: tpu_custom_call.1
= control target key start
LH: loop header
LB: loop body
LE: loop exit
PB: predicated region body
PF: predicated region fallthrough
CT: control target
= control target key end

     0   :  { %s1921_s0 = inlined_call_operand.hbm [shape: f32[32,32], index: 0, kind: input, shape index: {}]   ;;  %s1922_s1 = inlined_call_operand.hbm [shape: bf16[32,256], index: 1, kind: input, shape index: {}]   ;;  %s1923_s2 = inlined_call_operand.vmem [shape: f32[1,256], index: 2, kind: input, shape index: {}]   ;;  %s1924_s3 = inlined_call_operand.hbm [shape: bf16[256,128], index: 3, kind: input, shape index: {}]   ;;  %s1925_s4 = inlined_call_operand.vmem [shape: f32[1,128], index: 4, kind: input, shape index: {}]   ;;  %s1926_s5 = inlined_call_operand.hbm [shape: bf16[128,128], index: 5, kind: input, shape index: {}]   ;;  %s1927_s6 = inlined_call_operand.vmem [shape: f32[1,128], index: 6, kind: input, shape index: {}]   ;;  %s1928_s7 = inlined_call_operand.hbm [shape: bf16[128,128], index: 7, kind: input, shape index: {}]   ;;  %s1929_s8 = inlined_call_operand.vmem [shape: f32[1,128], index: 8, kind: input, shape index: {}]   ;;  %s1930_s9 = inlined_call_operand.hbm [shape: bf16[32,128], index: 9, kind: output, shape index: {}]  }
   0x1   :  { %1938 = sst [smem:[#allocation18_spill]] %s1929_s8 }
   0x2   :  { %1939 = sst [smem:[#allocation19_spill]] %s1930_s9 }
   0x3   :  { %14 = vsyncpa [#allocation3], 0 }
   0x4   :  { %16 = vsyncpa [#allocation3 + $0x1], 0 }
   0x5   :  { %17 = vsyncpa [#allocation6], 0 }
   0x6   :  { %18 = vsyncpa [#allocation9], 0 }
   0x7   :  { %19 = vsyncpa [#allocation4], 0 }
   0x8   :  { %21 = vsyncpa [#allocation4 + $0x1], 0  ;;  %s1615_s30 = smov 0   ;;  %s1617_s10 = smov 0  }
   0x9   :  { %s1619_s11 = smov 0   ;;  %s1621_s12 = smov 0  }
   0xa LB: > { %1940 = sst [smem:[#allocation16_spill]] %s1536_s30  ;;  %s1636_s13 = sadd.s32 4294967295, %s1548_s12   ;;  %s1548_s12 = sphi %s1621_s12, %s1966_s12   ;;  %s1544_s11 = sphi %s1619_s11, %s1965_s11   ;;  %s1540_s10 = sphi %s1617_s10, %s1964_s10   ;;  %s1536_s30 = sphi %s1615_s30, %s1963_s30  }
   0xb   : > { %s1045_s14 = sadd.s32 4294967294, %s1548_s12   ;;  %p47_p0 = scmp.ne.s32.totalorder %s1540_s10, %s1536_s30 }
   0xc   : > { %p1931_p1 = scmp.eq.s32.totalorder %s1636_s13, 0  ;;  %p245_p3 = scmp.eq.s32.totalorder %s1045_s14, 1 }
   0xd   : > { %p1046_p5 = scmp.ge.s32.totalorder %s1548_s12, 1  ;;  %p252_p7 = scmp.lt.s32.totalorder %s1548_s12, 3 }
   0xe   : > { %p1645_p4 = por %p1931_p1, %p47_p0  ;;  %p1650_p6 = por %p245_p3, %p47_p0 }
   0xf   : > { %p1655_p8 = pnand %p1046_p5, %p252_p7  ;;  %s1550_s18 = smov [#allocation5]  }
  0x10   : > { %s1941_s15 = scalar_select %p1645_p4, 1, 0 }
  0x11   : > { %s1942_s16 = scalar_select %p1650_p6, 1, 0 }
  0x12   : > { %s1944_s17 = scalar_select %p1655_p8, 1, 0 }
  0x13   : > { %1943 = sst [smem:[#allocation17_spill]] %s1942_s16  ;;  %s264_s19 = sshll.u32 %s1550_s18, 4  ;;  %s265_s19 = int_to_ptr.vmem [resolvable:$true] %s264_s19 }
  0x14   : > { %p1218_p9 = pneg %p1655_p8  ;;  %s1551_s21 = smov [#allocation8]  }
  0x15   : > { %s296_s22 = sshll.u32 %s1551_s21, 4  ;;  %s1332_s25 = scalar_lea.hbm %s1922_s1, 512  ;;  %s297_s22 = int_to_ptr.vmem [resolvable:$true] %s296_s22 }
  0x16   : > { %p1664_p11 = pnand %p1218_p9, %p1931_p1  ;;  %p1333_p12 = scmp.ne.s32.totalorder %s1922_s1, %s1332_s25 }
  0x17   : > { %p1339_p5 = scmp.lt.u32.totalorder %s1332_s25, %s1922_s1 }
  0x18   : > { %p1676_p13 = pneg %p1664_p11 }
  0x1a   : > { %p1335_p0 = pnand %p1676_p13, %p1333_p12 }
  0x1c   : > { %p1336_p3 = pneg %p1335_p0 }
  0x1e   : > { %p1341_p7 = pnand %p1339_p5, %p1336_p3 }
  0x20   : > { %1344 = shalt.err (!%p1341_p7)
}
  0x21   : > { %s1345_s18 = scalar_lea.vmem %s265_s19, 512  ;;  %p1353_p2 = scmp.lt.s32.totalorder %s265_s19, %s265_s19 }
  0x22   : > { %p1346_p9 = scmp.ne.s32.totalorder %s265_s19, %s1345_s18  ;;  %p1354_p6 = scmp.lt.s32.totalorder %s1345_s18, %s1345_s18 }
  0x24   : > { %p1348_p10 = pnand %p1346_p9, %p1676_p13  ;;  %p1355_p4 = por %p1354_p6, %p1353_p2 }
  0x26   : > { %p1349_p1 = pneg %p1348_p10 }
  0x28   : > { %p1356_p8 = pnand %p1355_p4, %p1349_p1 }
  0x2a   : > { %1359 = shalt.err (!%p1356_p8)
}
  0x2b   : > { %s1937_s21 = smov 128   ;;  %s1553_s23 = smov 8  }
  0x2c   : > { %1221 = dma.hbm_to_vmem [thread:$0]  (!%p1664_p11), %s1922_s1, 512, %s265_s19, [#allocation6], %s1937_s21, %s1937_s21, %s1553_s23  }
  0x2d   : > { %s1554_s26 = smov [#allocation7]   ;;  %s1360_s18 = scalar_lea.hbm %s1926_s5, 1024 }
  0x2e   : > { %s280_s27 = sshll.u32 %s1554_s26, 4  ;;  %p1361_p1 = scmp.ne.s32.totalorder %s1926_s5, %s1360_s18  ;;  %s281_s27 = int_to_ptr.vmem [resolvable:$true] %s280_s27 }
  0x2f   : > { %p1367_p6 = scmp.lt.u32.totalorder %s1360_s18, %s1926_s5 }
  0x30   : > { %p1363_p2 = pnand %p1361_p1, %p1676_p13 }
  0x32   : > { %p1364_p4 = pneg %p1363_p2 }
  0x34   : > { %p1369_p8 = pnand %p1367_p6, %p1364_p4 }
  0x36   : > { %1372 = shalt.err (!%p1369_p8)
}
  0x37   : > { %s1373_s19 = scalar_lea.vmem %s297_s22, 1024  ;;  %p1381_p3 = scmp.lt.s32.totalorder %s297_s22, %s297_s22 }
  0x38   : > { %p1374_p10 = scmp.ne.s32.totalorder %s297_s22, %s1373_s19  ;;  %p1382_p5 = scmp.lt.s32.totalorder %s1373_s19, %s1373_s19 }
  0x3a   : > { %p1376_p12 = pnand %p1374_p10, %p1676_p13  ;;  %p1383_p7 = por %p1382_p5, %p1381_p3 }
  0x3c   : > { %p1377_p0 = pneg %p1376_p12 }
  0x3e   : > { %p1384_p9 = pnand %p1383_p7, %p1377_p0 }
  0x40   : > { %1387 = shalt.err (!%p1384_p9)
}
  0x41   : > { %s1555_s30 = smov 64   ;;  %s1556_s16 = smov 4  }
  0x42   : > { %1227 = dma.hbm_to_vmem [thread:$0]  (!%p1664_p11), %s1926_s5, 1024, %s297_s22, [#allocation9], %s1555_s30, %s1555_s30, %s1556_s16  }
  0x43   : > { %s1388_s26 = scalar_lea.hbm %s1924_s3, 2048 }
  0x44   : > { %p1389_p1 = scmp.ne.s32.totalorder %s1924_s3, %s1388_s26  ;;  %p1395_p6 = scmp.lt.u32.totalorder %s1388_s26, %s1924_s3 }
  0x46   : > { %p1391_p2 = pnand %p1389_p1, %p1676_p13 }
  0x48   : > { %p1392_p4 = pneg %p1391_p2 }
  0x4a   : > { %p1397_p8 = pnand %p1395_p6, %p1392_p4 }
  0x4c   : > { %1400 = shalt.err (!%p1397_p8)
}
  0x4d   : > { %s1401_s8 = scalar_lea.vmem %s281_s27, 2048  ;;  %p1409_p3 = scmp.lt.s32.totalorder %s281_s27, %s281_s27 }
  0x4e   : > { %p1402_p10 = scmp.ne.s32.totalorder %s281_s27, %s1401_s8  ;;  %p1410_p5 = scmp.lt.s32.totalorder %s1401_s8, %s1401_s8 }
  0x50   : > { %p1404_p12 = pnand %p1402_p10, %p1676_p13  ;;  %p1411_p7 = por %p1410_p5, %p1409_p3 }
  0x52   : > { %p1405_p0 = pneg %p1404_p12 }
  0x54   : > { %p1412_p9 = pnand %p1411_p7, %p1405_p0 }
  0x56   : > { %1415 = shalt.err (!%p1412_p9)
}
  0x57   : > { %1224 = dma.hbm_to_vmem [thread:$0]  (!%p1664_p11), %s1924_s3, 2048, %s281_s27, [#allocation6], %s1555_s30, %s1555_s30, %s1556_s16  }
  0x58   : > { %s1557_s24 = smov [#allocation10]   ;;  %s1416_s14 = scalar_lea.hbm %s1928_s7, 1024 }
  0x59   : > { %s312_s25 = sshll.u32 %s1557_s24, 4  ;;  %p1417_p1 = scmp.ne.s32.totalorder %s1928_s7, %s1416_s14  ;;  %s313_s25 = int_to_ptr.vmem [resolvable:$true] %s312_s25 }
  0x5a   : > { %p1423_p6 = scmp.lt.u32.totalorder %s1416_s14, %s1928_s7 }
  0x5b   : > { %p1419_p2 = pnand %p1417_p1, %p1676_p13 }
  0x5d   : > { %p1420_p4 = pneg %p1419_p2 }
  0x5f   : > { %p1425_p8 = pnand %p1423_p6, %p1420_p4 }
  0x61   : > { %1428 = shalt.err (!%p1425_p8)
}
  0x62   : > { %s1429_s27 = scalar_lea.vmem %s313_s25, 1024  ;;  %p1437_p3 = scmp.lt.s32.totalorder %s313_s25, %s313_s25 }
  0x63   : > { %p1430_p10 = scmp.ne.s32.totalorder %s313_s25, %s1429_s27  ;;  %p1438_p5 = scmp.lt.s32.totalorder %s1429_s27, %s1429_s27 }
  0x65   : > { %p1432_p12 = pnand %p1430_p10, %p1676_p13  ;;  %p1439_p7 = por %p1438_p5, %p1437_p3 }
  0x67   : > { %p1433_p0 = pneg %p1432_p12 }
  0x69   : > { %p1440_p9 = pnand %p1439_p7, %p1433_p0 }
  0x6b   : > { %1443 = shalt.err (!%p1440_p9)
}
  0x6c   : > { %1230 = dma.hbm_to_vmem [thread:$0]  (!%p1664_p11), %s1928_s7, 1024, %s313_s25, [#allocation9], %s1555_s30, %s1555_s30, %s1556_s16  }
  0x6d   : > { %s1759_s28 = sadd.s32 1, %s1548_s12   ;;  %s34_s20 = sadd.s32 1, %s1544_s11 }
  0x6e   : > { %s31_s9 = ssub.s32 %s1548_s12, %s1759_s28  ;;  %p41_p13 = scmp.ne.s32.totalorder %s1544_s11, %s1540_s10 }
  0x6f   : > { %p32_p1 = scmp.eq.s32.totalorder %s31_s9, 0  ;;  %p42_p2 = scmp.eq.s32.totalorder %s1548_s12, 0 }
  0x70   : > { %p1947_p4 = scmp.eq.s32.totalorder %s1636_s13, 1  ;;  %p1243_p8 = scmp.lt.s32.totalorder %s1548_s12, 2 }
  0x71   : > { %s1775_s26 = scalar_select %p32_p1, %s1544_s11, %s34_s20  }
  0x72   : > { %p1769_p6 = por %p1947_p4, %p41_p13  ;;  %p43_p10 = por %p42_p2, %p41_p13 }
  0x73   : > { %s329_s29 = sand.u32 1, %s1544_s11   ;;  %s1109_s30 = sshll.u32 %s1548_s12, 8 }
  0x74   : > { %s1052_s14 = sshll.u32 %s329_s29, 4  ;;  %s1782_s18 = scalar_lea.hbm %s1921_s0, %s1109_s30 }
  0x75   : > { %s333_s19 = scalar_lea.vmem [#allocation2], %s1052_s14  ;;  %p1786_p11 = pnand %p1243_p8, %p43_p10 }
  0x76   : > { %s340_s8 = sshll.u32 %s333_s19, 4  ;;  %s1790_s21 = scalar_lea.sflag [#allocation3], %s329_s29  ;;  %s1784_s8 = int_to_ptr.vmem [resolvable:$true] %s340_s8 }
  0x77   : > { %s1444_s22 = scalar_lea.hbm %s1782_s18, 256  ;;  %p1446_p0 = pneg %p1786_p11 }
  0x78   : > { %p1445_p12 = scmp.ne.s32.totalorder %s1782_s18, %s1444_s22  ;;  %s1449_s14 = scalar_lea.hbm %s1921_s0, 512 }
  0x79   : > { %p1450_p7 = scmp.lt.u32.totalorder %s1782_s18, %s1921_s0  ;;  %p1451_p9 = scmp.lt.u32.totalorder %s1449_s14, %s1444_s22 }
  0x7a   : > { %p1447_p3 = pnand %p1446_p0, %p1445_p12  ;;  %p1453_p1 = scmp.lt.u32.totalorder %s1444_s22, %s1782_s18 }
  0x7b   : > { %p1452_p13 = por %p1451_p9, %p1450_p7 }
  0x7c   : > { %p1448_p5 = pneg %p1447_p3 }
  0x7d   : > { %p1454_p2 = por %p1453_p1, %p1452_p13 }
  0x7f   : > { %p1455_p4 = pnand %p1454_p2, %p1448_p5 }
  0x81   : > { %1458 = shalt.err (!%p1455_p4)
}
  0x82   : > { %s1459_s29 = scalar_lea.vmem %s1784_s8, 256  ;;  %s1558_s25 = smov [#allocation2]  }
  0x83   : > { %p1460_p8 = scmp.ne.s32.totalorder %s1784_s8, %s1459_s29  ;;  %s1464_s19 = sshll.u32 %s1558_s25, 4  ;;  %s1465_s19 = int_to_ptr.vmem [resolvable:$false] %s1464_s19 }
  0x84   : > { %s1466_s20 = scalar_lea.vmem %s1465_s19, 512  ;;  %p1467_p3 = scmp.lt.s32.totalorder %s1784_s8, %s1465_s19 }
  0x85   : > { %p1462_p10 = pnand %p1460_p8, %p1446_p0  ;;  %p1468_p7 = scmp.lt.s32.totalorder %s1466_s20, %s1459_s29 }
  0x87   : > { %p1463_p12 = pneg %p1462_p10  ;;  %p1469_p9 = por %p1468_p7, %p1467_p3 }
  0x89   : > { %p1470_p13 = pnand %p1469_p9, %p1463_p12 }
  0x8b   : > { %1473 = shalt.err (!%p1470_p13)
}
  0x8c   : > { %s1950_s22 = smov 128   ;;  %p1951_p0 = scmp.ne.s32.totalorder %s1944_s17, 0 }
  0x8d   : > { %1234 = dma.hbm_to_vmem [thread:$0]  (!%p1786_p11), %s1782_s18, 256, %s1784_s8, %s1790_s21, %s1950_s22, %s1950_s22, %s1553_s23  }
  0x8e   : > { %352 = sbr.rel (%p1951_p0) target bundleno = 1063 (0x427), region = 56  ;;  %s1824_s9 = sand.u32 (!%p1951_p0), 1, %s1540_s10  }
  0x8f   : > { %s1056_s14 = sshll.u32 (!%p1951_p0), %s1824_s9, 4  ;;  %s355_s30 = scalar_lea.sflag (!%p1951_p0), [#allocation3], %s1824_s9 }
  0x90   : > { %s358_s16 = scalar_lea.vmem (!%p1951_p0), [#allocation2], %s1056_s14  ;;  %p1952_p5 = scmp.ne.s32.totalorder (!%p1951_p0), %s1941_s15, 0 }
  0x95   : > { %1519 = dma.done.wait (%p1952_p5), %s355_s30, 256  }
  0x96   : > { %1521 = vsyncadd (%p1952_p5), %s355_s30, 4294967040  ;;  %p1953_p1 = scmp.eq.s32.totalorder %s1636_s13, 0 }
  0x98   : > { %1523 = dma.done.wait (%p1953_p1), [#allocation6], 2560   ;;  %p1954_p11 = pmov %p1953_p1 }
  0x99   : > { %p1955_p2 = pmov %p1953_p1 }
  0x9a   : > { %1525 = vsyncadd (%p1954_p11), [#allocation6], 4294964736 }
  0x9b   : > { %1527 = dma.done.wait (%p1955_p2), [#allocation9], 2048   ;;  %p1956_p4 = pmov %p1953_p1 }
  0x9c   : > { %v1559_v0 = vmov 0   ;;  %v1294_v1 = vld [vmem:[#allocation5 + $0x4] ss:$8 sps:$4 sm:$0xff]   ;;  %v1296_v2 = vld [vmem:[#allocation5] ss:$8 sps:$4 sm:$0xff]   ;;  %vm451_vm0 = vcmask 261120   ;;  %v421_v30 = vlaneseq }
  0x9d   : > { %1529 = vsyncadd (%p1956_p4), [#allocation9], 4294965248  ;;  %487 = vmatprep.mubr.bf16.mxu0 %v1559_v0  ;;  %455 = vmatprep.subr.bf16.mxu0 %v1294_v1  ;;  %v1297_v3 = vld [vmem:[#allocation5 + $0x14] ss:$8 sps:$4 sm:$0xff]   ;;  %v1299_v4 = vld [vmem:[#allocation5 + $0x10] ss:$8 sps:$4 sm:$0xff]  }
  0x9e   : > { %v412_v5 = vld [vmem:[%s358_s16] sm:$0xff]  ;;  %456 = vmatpush1.bf16.msra.mxu0 %v1296_v2  ;;  %v413_v6 = vld [vmem:[%s358_s16 + $0x8] sm:$0xff]  ;;  %v1560_v25 = vmov 0.0   ;;  %v422_v31 = vshrl.u32 %v421_v30, 7  ;;  %vm1561_vm1 = vmmov 0   ;;  %s1061_s21 = sshll.u32 %s1824_s9, 3 }
  0x9f   : > { %457 = vmatprep.subr.bf16.mxu0 %v1297_v3  ;;  %v1300_v7 = vld [vmem:[#allocation7 + $0x40] sm:$0xff]   ;;  %v414_v9 = vpack.c.bf16 %v413_v6, %v412_v5  ;;  %v1302_v10 = vld [vmem:[#allocation7 + $0x48] sm:$0xff]   ;;  %v1304_v12 = vld [vmem:[#allocation7 + $0x50] sm:$0xff]   ;;  %s1957_s19 = sld [smem:[#allocation18_spill]]  ;;  %s408_s20 = scalar_lea.vmem [#allocation11], %s1061_s21 }
  0xa0   : > { %v1301_v8 = vld [vmem:[#allocation7] sm:$0xff]   ;;  %1118 = vmatprep.subr.bf16.mxu1 %v1300_v7  ;;  %v1303_v11 = vld [vmem:[#allocation7 + $0x8] sm:$0xff]   ;;  %v1305_v13 = vld [vmem:[#allocation7 + $0x10] sm:$0xff]   ;;  %v423_v32 = vsub.s32 0, %v422_v31  ;;  %v427_v34 = vsub.s32 1, %v422_v31  ;;  %s934_s22 = sshll.u32 %s408_s20, 4  ;;  %s1872_s22 = int_to_ptr.vmem [resolvable:$true] %s934_s22 }
  0xa1   : > { %1119 = vmatpush3.bf16.msra.mxu1 %v1301_v8  ;;  %v1306_v14 = vld [vmem:[#allocation7 + $0x58] sm:$0xff]   ;;  %v1308_v16 = vld [vmem:[#allocation7 + $0x60] sm:$0xff]   ;;  %v1310_v18 = vld [vmem:[#allocation7 + $0x68] sm:$0xff]   ;;  %s1112_s14 = sshll.u32 %s1636_s13, 7  ;;  %s1958_s15 = sld [smem:[#allocation19_spill]] }
  0xa2   : > { %458 = vmatpush1.bf16.msra.mxu0 %v1299_v4  ;;  %1120 = vmatprep.subr.bf16.mxu1 %v1302_v10  ;;  %v1307_v15 = vld [vmem:[#allocation7 + $0x18] sm:$0xff]   ;;  %v1309_v17 = vld [vmem:[#allocation7 + $0x20] sm:$0xff]   ;;  %v1311_v19 = vld [vmem:[#allocation7 + $0x28] sm:$0xff]   ;;  %s921_s23 = scalar_lea.sflag [#allocation4], %s1824_s9  ;;  %s1474_s18 = scalar_lea.vmem %s1872_s22, 128 }
  0xa3   : > { %v1312_v20 = vld [vmem:[#allocation7 + $0x70] sm:$0xff]   ;;  %v1314_v22 = vld [vmem:[#allocation7 + $0x78] sm:$0xff]   ;;  %v1316_v24 = vld [vmem:[#allocation8] sm:$0xff]   ;;  %1158 = vmatprep.subr.bf16.mxu0 %v1560_v25  ;;  %p1475_p8 = scmp.ne.s32.totalorder %s1872_s22, %s1474_s18  ;;  %s1562_s13 = smov [#allocation11]  }
  0xa4   : > { %v1313_v21 = vld [vmem:[#allocation7 + $0x30] sm:$0xff]   ;;  %v1315_v23 = vld [vmem:[#allocation7 + $0x38] sm:$0xff]   ;;  %v1317_v26 = vld [vmem:[#allocation8 + $0x8] sm:$0xff]   ;;  %s1478_s8 = sshll.u32 %s1562_s13, 4  ;;  %s1479_s8 = int_to_ptr.vmem [resolvable:$false] %s1478_s8 }
  0xa5   : > { %1066 = vmatmul.mubr.msk.bf16.vlgmr.msra.gmra.mrb[0].mxu0 %vm451_vm0, %v414_v9  ;;  %1121 = vmatpush3.bf16.msra.mxu1 %v1303_v11  ;;  %v1318_v27 = vld [vmem:[#allocation8 + $0x10] sm:$0xff]   ;;  %v1319_v28 = vld [vmem:[#allocation8 + $0x18] sm:$0xff]   ;;  %v1320_v29 = vld [vmem:[#allocation8 + $0x20] sm:$0xff]   ;;  %p1476_p10 = pnand %p1475_p8, %p1769_p6  ;;  %s1480_s27 = scalar_lea.vmem %s1479_s8, 256 }
  0xa6   : > { %1122 = vmatprep.subr.bf16.mxu1 %v1304_v12  ;;  %1159 = vmatpush3.bf16.msra.mxu0 %v1316_v24  ;;  %v419_v33 = vld [vmem:[%s1923_s2] sm:$0x3]  ;;  %v1321_v51 = vld [vmem:[#allocation8 + $0x28] sm:$0xff]   ;;  %v1322_v52 = vld [vmem:[#allocation8 + $0x30] sm:$0xff]   ;;  %p1481_p3 = scmp.lt.s32.totalorder %s1872_s22, %s1479_s8  ;;  %p1482_p7 = scmp.lt.s32.totalorder %s1480_s27, %s1474_s18 }
  0xa7   : > { %1160 = vmatprep.subr.bf16.mxu0 %v1560_v25  ;;  %v424_v35 = vrot.slane %v419_v33, %v423_v32  ;;  %v428_v36 = vrot.slane %v419_v33, %v427_v34  ;;  %v1323_v53 = vld [vmem:[#allocation8 + $0x38] sm:$0xff]   ;;  %1174 = vmatprep.mubr.msk.bf16.mxu0 %vm1561_vm1, %v1560_v25  ;;  %v1324_v54 = vld [vmem:[#allocation10] sm:$0xff]   ;;  %v1325_v55 = vld [vmem:[#allocation10 + $0x8] sm:$0xff]   ;;  %s1877_s17 = scalar_lea.hbm %s1958_s15, %s1112_s14  ;;  %p1477_p12 = pneg %p1476_p10 }
  0xa8   : > { %v1326_v56 = vld [vmem:[#allocation10 + $0x10] sm:$0xff]   ;;  %v1327_v57 = vld [vmem:[#allocation10 + $0x18] sm:$0xff]   ;;  %v1328_v58 = vld [vmem:[#allocation10 + $0x20] sm:$0xff]   ;;  %p1483_p9 = por %p1482_p7, %p1481_p3 }
  0xa9   : > { %1123 = vmatpush3.bf16.msra.mxu1 %v1305_v13  ;;  %v1329_v59 = vld [vmem:[#allocation10 + $0x28] sm:$0xff]   ;;  %v1067_v61 = vld [vmem:[%s1925_s4] ss:$0 sm:$0xff]  ;;  %v1330_v8 = vld [vmem:[#allocation10 + $0x30] sm:$0xff]  }
  0xaa   : > { %1124 = vmatprep.subr.bf16.mxu1 %v1306_v14  ;;  %1161 = vmatpush3.bf16.msra.mxu0 %v1317_v26  ;;  %v1331_v9 = vld [vmem:[#allocation10 + $0x38] sm:$0xff]   ;;  %v1084_v10 = vld [vmem:[%s1927_s6] ss:$0 sm:$0xff]  ;;  %p1484_p13 = pnand %p1483_p9, %p1477_p12 }
  0xab   : > { %1162 = vmatprep.subr.bf16.mxu0 %v1560_v25 }
  0xad   : > { %1125 = vmatpush3.bf16.msra.mxu1 %v1307_v15 }
  0xae   : > { %1126 = vmatprep.subr.bf16.mxu1 %v1308_v16  ;;  %1163 = vmatpush3.bf16.msra.mxu0 %v1318_v27 }
  0xaf   : > { %1164 = vmatprep.subr.bf16.mxu0 %v1560_v25 }
  0xb1   : > { %1127 = vmatpush3.bf16.msra.mxu1 %v1309_v17 }
  0xb2   : > { %1128 = vmatprep.subr.bf16.mxu1 %v1310_v18  ;;  %1165 = vmatpush3.bf16.msra.mxu0 %v1319_v28 }
  0xb3   : > { %1166 = vmatprep.subr.bf16.mxu0 %v1560_v25 }
  0xb5   : > { %1129 = vmatpush3.bf16.msra.mxu1 %v1311_v19 }
  0xb6   : > { %1130 = vmatprep.subr.bf16.mxu1 %v1312_v20  ;;  %1167 = vmatpush3.bf16.msra.mxu0 %v1320_v29  ;;  %v1093_v20 = vld [vmem:[%s1957_s19] ss:$0 sm:$0xff] }
  0xb7   : > { %1168 = vmatprep.subr.bf16.mxu0 %v1560_v25 }
  0xb9   : > { %1131 = vmatpush3.bf16.msra.mxu1 %v1313_v21 }
  0xba   : > { %1132 = vmatprep.subr.bf16.mxu1 %v1314_v22  ;;  %1169 = vmatpush3.bf16.msra.mxu0 %v1321_v51 }
  0xbb   : > { %1170 = vmatprep.subr.bf16.mxu0 %v1560_v25 }
  0xbd   : > { %1133 = vmatpush3.bf16.msra.mxu1 %v1315_v23 }
  0xbe   : > { %1178 = vmatprep.subr.bf16.mxu1 %v1560_v25  ;;  %1171 = vmatpush3.bf16.msra.mxu0 %v1322_v52 }
  0xbf   : > { %1172 = vmatprep.subr.bf16.mxu0 %v1560_v25 }
  0xc2   : > { %1173 = vmatpush3.bf16.msra.mxu0 %v1323_v53 }
 0x178   : > { %v489_v37 = vpop.f32.mrb[0].mxu0 }
 0x179   : > { %v490_v38 = vadd.f32 %v489_v37, %v424_v35  ;;  %v491_v39 = vpop.f32.mrb[1].mxu0 }
 0x17a   : > { %v492_v40 = vadd.f32 %v491_v39, %v428_v36  ;;  %v493_v41 = vpop.f32.mrb[2].mxu0 }
 0x17b   : > { %v494_v42 = vadd.f32 %v493_v41, %v424_v35  ;;  %v495_v43 = vpop.f32.mrb[3].mxu0  ;;  %v498_v45 = vmax.f32 %v490_v38, 0.0 }
 0x17c   : > { %v496_v44 = vadd.f32 %v495_v43, %v428_v36  ;;  %v499_v47 = vmax.f32 %v492_v40, 0.0 }
 0x17d   : > { %v500_v46 = vmax.f32 %v494_v42, 0.0 }
 0x17e   : > { %v501_v48 = vmax.f32 %v496_v44, 0.0 }
 0x17f   : > { %v502_v49 = vpack.c.bf16 %v500_v46, %v498_v45 }
 0x180   : > { %v503_v50 = vpack.c.bf16 %v501_v48, %v499_v47 }
 0x182   : > { %671 = vmatprep.mubr.bf16.mxu1 %v503_v50 }
 0x183   : > { %672 = vmatmul.mubr.bf16.vlgmr.msra.gmra.mrb[0].mxu1 %v502_v49 }
 0x184   : > { %1194 = vmatprep.mubr.msk.bf16.mxu1 %vm1561_vm1, %v1560_v25  ;;  %1179 = vmatpush3.bf16.msra.mxu1 %v1324_v54 }
 0x185   : > { %1180 = vmatprep.subr.bf16.mxu1 %v1560_v25 }
 0x188   : > { %1181 = vmatpush3.bf16.msra.mxu1 %v1325_v55 }
 0x189   : > { %1182 = vmatprep.subr.bf16.mxu1 %v1560_v25 }
 0x18c   : > { %1183 = vmatpush3.bf16.msra.mxu1 %v1326_v56 }
 0x18d   : > { %1184 = vmatprep.subr.bf16.mxu1 %v1560_v25 }
 0x190   : > { %1185 = vmatpush3.bf16.msra.mxu1 %v1327_v57 }
 0x191   : > { %1186 = vmatprep.subr.bf16.mxu1 %v1560_v25 }
 0x194   : > { %1187 = vmatpush3.bf16.msra.mxu1 %v1328_v58 }
 0x195   : > { %1188 = vmatprep.subr.bf16.mxu1 %v1560_v25 }
 0x198   : > { %1189 = vmatpush3.bf16.msra.mxu1 %v1329_v59 }
 0x199   : > { %1190 = vmatprep.subr.bf16.mxu1 %v1560_v25 }
 0x19c   : > { %1191 = vmatpush3.bf16.msra.mxu1 %v1330_v8 }
 0x19d   : > { %1192 = vmatprep.subr.bf16.mxu1 %v1560_v25 }
 0x1a0   : > { %1193 = vmatpush3.bf16.msra.mxu1 %v1331_v9 }
 0x256   : > { %v1134_v60 = vpop.f32.mrb[0].mxu1 }
 0x257   : > { %v1135_v62 = vpop.f32.mrb[1].mxu1 }
 0x258   : > { %v1136_v63 = vadd.f32 %v1135_v62, %v1134_v60  ;;  %v1137_v0 = vpop.f32.mrb[2].mxu1 }
 0x259   : > { %v1138_v1 = vpop.f32.mrb[3].mxu1 }
 0x25a   : > { %v674_v2 = vadd.f32 %v1136_v63, %v1067_v61  ;;  %v1139_v3 = vadd.f32 %v1138_v1, %v1137_v0 }
 0x25c   : > { %v677_v4 = vadd.f32 %v1139_v3, %v1067_v61  ;;  %v680_v5 = vmax.f32 %v674_v2, 0.0 }
 0x25e   : > { %v681_v6 = vmax.f32 %v677_v4, 0.0 }
 0x260   : > { %v682_v7 = vpack.c.bf16 %v681_v6, %v680_v5 }
 0x262   : > { %1175 = vmatmul.mubr.bf16.vlgmr.msra.gmra.mrb[4].mxu0 %v682_v7 }
 0x335   : > { %v788_v11 = vpop.f32.mrb[4].mxu0 }
 0x336   : > { %v789_v12 = vadd.f32 %v1084_v10, %v788_v11  ;;  %v1176_v13 = vpop.f32.mrb[5].mxu0 }
 0x337   : > { %v791_v14 = vpop.f32.mrb[6].mxu0 }
 0x338   : > { %v792_v15 = vadd.f32 %v1084_v10, %v791_v14  ;;  %v1177_v16 = vpop.f32.mrb[7].mxu0  ;;  %v795_v17 = vmax.f32 %v789_v12, 0.0 }
 0x33a   : > { %v796_v18 = vmax.f32 %v792_v15, 0.0 }
 0x33c   : > { %v797_v19 = vpack.c.bf16 %v796_v18, %v795_v17 }
 0x33e   : > { %1195 = vmatmul.mubr.bf16.vlgmr.msra.gmra.mrb[4].mxu1 %v797_v19 }
 0x411   : > { %v903_v21 = vpop.f32.mrb[4].mxu1 }
 0x412   : > { %v1196_v22 = vpop.f32.mrb[5].mxu1  ;;  %v904_v24 = vadd.f32 %v1093_v20, %v903_v21 }
 0x413   : > { %v906_v23 = vpop.f32.mrb[6].mxu1 }
 0x414   : > { %v907_v25 = vadd.f32 %v1093_v20, %v906_v23  ;;  %v1197_v26 = vpop.f32.mrb[7].mxu1 }
 0x416   : > { %v1116_v27 = vpack.c.bf16 %v907_v25, %v904_v24 }
 0x418   : > { %1117 = vst [vmem:[%s408_s20] sm:$0xff] %v1116_v27  }
 0x419   : > { %1487 = shalt.err (!%p1484_p13)
}
 0x41a   : > { %s1488_s21 = scalar_lea.hbm %s1877_s17, 128  ;;  %s1492_s19 = scalar_lea.hbm %s1958_s15, 256 }
 0x41b   : > { %p1489_p0 = scmp.ne.s32.totalorder %s1877_s17, %s1488_s21  ;;  %p1493_p11 = scmp.lt.u32.totalorder %s1877_s17, %s1958_s15 }
 0x41c   : > { %p1494_p2 = scmp.lt.u32.totalorder %s1492_s19, %s1488_s21  ;;  %p1496_p8 = scmp.lt.u32.totalorder %s1488_s21, %s1877_s17 }
 0x41d   : > { %p1490_p5 = pnand %p1489_p0, %p1769_p6 }
 0x41e   : > { %p1495_p4 = por %p1494_p2, %p1493_p11 }
 0x41f   : > { %p1491_p1 = pneg %p1490_p5 }
 0x420   : > { %p1497_p10 = por %p1496_p8, %p1495_p4 }
 0x422   : > { %p1498_p12 = pnand %p1497_p10, %p1491_p1 }
 0x424   : > { %1501 = shalt.err (!%p1498_p12)
}
 0x425   : > { %s1563_s30 = smov 64   ;;  %s1564_s16 = smov 4  }
 0x426   : > { %1216 = dma.vmem_to_hbm [thread:$0]  (%p1769_p6), %s1872_s22, 128, %s1877_s17, %s921_s23, %s1563_s30, %s1563_s30, %s1564_s16  }
 0x427 PF: > { %s1959_s18 = sld [smem:[#allocation16_spill]]  ;;  %s1960_s13 = sld [smem:[#allocation17_spill]] }
 0x428   : > { %p1962_p7 = scmp.ge.s32.totalorder %s1548_s12, 2 }
 0x42d   : > { %s949_s8 = sand.u32 1, %s1959_s18   ;;  %p1961_p3 = scmp.ne.s32.totalorder %s1960_s13, 0 }
 0x42e   : > { %s950_s27 = scalar_lea.sflag [#allocation4], %s949_s8 }
 0x42f   : > { %p1236_p9 = pnand %p1962_p7, %p1961_p3 }
 0x431   : > { %1531 = dma.done.wait (!%p1236_p9), %s950_s27, 128  }
 0x432   : > { %1533 = vsyncadd (!%p1236_p9), %s950_s27, 4294967168  ;;  %p24_p13 = scmp.ge.s32.totalorder %s1759_s28, 4   ;;  %s1963_s30 = smov %s1540_s10 }
 0x433   : > { %s1964_s10 = smov %s1544_s11  ;;  %s1965_s11 = smov %s1775_s26 }
 0x434   : > { %s1966_s12 = smov %s1759_s28  ;;  %26 = sbr.rel (!%p24_p13) target bundleno = 10 (0xa), region = 117 }
 0x43b   :  { %955 = vsyncpa [#allocation3], 1 }
 0x43c   :  { %957 = vsyncpa [#allocation3 + $0x1], 1 }
 0x43d   :  { %958 = vsyncpa [#allocation6], 1 }
 0x43e   :  { %959 = vsyncpa [#allocation9], 1 }
 0x43f   :  { %960 = vsyncpa [#allocation4], 1 }
 0x440   :  { %962 = vsyncpa [#allocation4 + $0x1], 1 }

</bundles_post_ra>
